<compile_context>
chip_gen: v5e
topology: v5e:2x2
jax: 0.10.0
libtpu: 0.0.40
codegen_flags: <defaults>
</compile_context>

<pallas_src>
import functools

import jax
import jax.numpy as jnp
from jax.experimental import pallas as pl
from jax.experimental.pallas import tpu as pltpu


def _label_smooth_ce_kernel(x_ref, t_ref, loss_ref,
                            m_sc, l_sc, sx_sc, xt_sc, *,
                            epsilon: float, num_classes: int):
    """One (batch-tile, class-tile) grid step.

    x_ref:    (TB, TC) logits tile
    t_ref:    (TB, 1) int32 labels (resident per batch tile)
    loss_ref: (TB, 1) f32 per-row loss, written at the last class step
    scratch:  (TB, 1) f32 running max / sum-exp / sum-logits / target-logit
    """
    j = pl.program_id(1)
    n_class_blocks = pl.num_programs(1)

    @pl.when(j == 0)
    def _init():
        m_sc[...] = jnp.full_like(m_sc, -jnp.inf)
        l_sc[...] = jnp.zeros_like(l_sc)
        sx_sc[...] = jnp.zeros_like(sx_sc)
        xt_sc[...] = jnp.zeros_like(xt_sc)

    x = x_ref[...].astype(jnp.float32)
    tb, tc = x.shape

    # Global class index of each lane in this tile; mask padded classes when C is not a
    # multiple of the class tile (padded lanes otherwise corrupt lse / sums).
    cls_idx = j * tc + jax.lax.broadcasted_iota(jnp.int32, (tb, tc), 1)
    cls_valid = cls_idx < num_classes
    x_max_in = jnp.where(cls_valid, x, -jnp.inf)
    x_sum_in = jnp.where(cls_valid, x, 0.0)

    # Online logsumexp over class tiles (lane-axis reductions -> XLU slot).
    m_prev = m_sc[...]
    m_new = jnp.maximum(m_prev, jnp.max(x_max_in, axis=1, keepdims=True))
    alpha = jnp.exp(m_prev - m_new)
    l_sc[...] = alpha * l_sc[...] + jnp.sum(jnp.exp(x_max_in - m_new),
                                            axis=1, keepdims=True)
    m_sc[...] = m_new

    # Running sum of logits (for the eps/K smoothing term).
    sx_sc[...] += jnp.sum(x_sum_in, axis=1, keepdims=True)

    # Target logit via iota-compare masked select (scatter-free one-hot).
    # Note: out-of-range labels silently contribute 0 here (no error like PyTorch).
    xt_sc[...] += jnp.sum(jnp.where(cls_idx == t_ref[...], x, 0.0),
                          axis=1, keepdims=True)

    @pl.when(j == n_class_blocks - 1)
    def _finalize():
        lse = m_sc[...] + jnp.log(l_sc[...])
        loss_ref[...] = (lse
                         - (1.0 - epsilon) * xt_sc[...]
                         - (epsilon / num_classes) * sx_sc[...])


def _choose_tiles(b, c, itemsize):
    """Pick (TB, TC) so a double-buffered logits block fits scoped VMEM on all gens."""
    # Class tile: whole row when modest, otherwise lane-aligned chunks (online LSE path).
    tc = c if c <= 4096 else 2048                       # 2048 % 128 == 0
    # Batch tile: one logits buffer <= ~2 MiB (x2 for double-buffering + scratch
    # headroom -> safe within v5e's 16 MiB scoped-VMEM default and v6e/v7x's 32 MiB).
    sub = 8 * (4 // max(1, itemsize))                   # sublane pack: 8 for f32, 16 bf16
    target_bytes = 2 * 1024 * 1024
    tb = max(1, target_bytes // (tc * itemsize))
    if tb >= b:
        tb = b                                          # full batch dim is always legal
    else:
        tb = max(sub, (tb // sub) * sub)
    return tb, tc


def cross_entropy_label_smooth(inputs, targets, *, epsilon: float = 0.1,
                               block_b=None, block_c=None):
    """inputs: (B, C) float logits; targets: (B,) int labels. Returns scalar f32 loss."""
    b, c = inputs.shape
    targets_2d = targets.astype(jnp.int32).reshape(b, 1)

    itemsize = jnp.dtype(inputs.dtype).itemsize
    tb, tc = _choose_tiles(b, c, itemsize)
    if block_b is not None:
        tb = min(block_b, b)
    if block_c is not None:
        tc = min(block_c, c)
    nb = pl.cdiv(b, tb)
    nc = pl.cdiv(c, tc)

    kernel = functools.partial(_label_smooth_ce_kernel,
                               epsilon=float(epsilon), num_classes=c)

    per_row_loss = pl.pallas_call(
        kernel,
        out_shape=jax.ShapeDtypeStruct((b, 1), jnp.float32),
        grid=(nb, nc),
        in_specs=[
            pl.BlockSpec((tb, tc), lambda i, j: (i, j)),   # logits tile
            pl.BlockSpec((tb, 1), lambda i, j: (i, 0)),    # labels, resident per batch tile
        ],
        out_specs=pl.BlockSpec((tb, 1), lambda i, j: (i, 0)),
        scratch_shapes=[
            pltpu.VMEM((tb, 1), jnp.float32),   # running max
            pltpu.VMEM((tb, 1), jnp.float32),   # running sum of exp
            pltpu.VMEM((tb, 1), jnp.float32),   # running sum of logits
            pltpu.VMEM((tb, 1), jnp.float32),   # target logit
        ],
        compiler_params=pltpu.CompilerParams(
            dimension_semantics=("parallel", "arbitrary")),
    )(inputs, targets_2d)

    # (-targets * log_probs).mean(0).sum() == sum_b(per_row_loss) / B.
    # Divide by B exactly once here -> correct for any batch tiling.
    return jnp.sum(per_row_loss) / b


def _reference(inputs, targets, epsilon=0.1):
    c = inputs.shape[1]
    log_probs = jax.nn.log_softmax(inputs.astype(jnp.float32), axis=1)
    one_hot = jax.nn.one_hot(targets, c, dtype=jnp.float32)
    tgt = (1.0 - epsilon) * one_hot + epsilon / c
    return jnp.sum(jnp.mean(-tgt * log_probs, axis=0))


if __name__ == "__main__":
    key = jax.random.PRNGKey(0)

    # 1) Small shape matching the module's (batch, num_classes) convention.
    k1, k2 = jax.random.split(key)
    b0, c0 = 8, 16
    x0 = jax.random.normal(k1, (b0, c0), dtype=jnp.float32)
    t0 = jax.random.randint(k2, (b0,), 0, c0, dtype=jnp.int32)
    out0 = jax.block_until_ready(cross_entropy_label_smooth(x0, t0, epsilon=0.1))
    ref0 = _reference(x0, t0, 0.1)
    assert jnp.allclose(out0, ref0, atol=1e-5, rtol=1e-4), (out0, ref0)

    # 2) Multi-tile path: batch + class tiling with online logsumexp.
    k3, k4 = jax.random.split(k1)
    b1, c1 = 24, 384
    x1 = 4.0 * jax.random.normal(k3, (b1, c1), dtype=jnp.float32)
    t1 = jax.random.randint(k4, (b1,), 0, c1, dtype=jnp.int32)
    out1 = jax.block_until_ready(
        cross_entropy_label_smooth(x1, t1, epsilon=0.1, block_b=8, block_c=128))
    ref1 = _reference(x1, t1, 0.1)
    assert jnp.allclose(out1, ref1, atol=1e-5, rtol=1e-4), (out1, ref1)

    # 3) Ragged shapes: B and C not multiples of the tiles (padding-mask paths).
    k5, k6 = jax.random.split(k2)
    b2, c2 = 13, 200
    x2 = jax.random.normal(k5, (b2, c2), dtype=jnp.float32)
    t2 = jax.random.randint(k6, (b2,), 0, c2, dtype=jnp.int32)
    out2 = jax.block_until_ready(
        cross_entropy_label_smooth(x2, t2, epsilon=0.1, block_b=8, block_c=128))
    ref2 = _reference(x2, t2, 0.1)
    assert jnp.allclose(out2, ref2, atol=1e-5, rtol=1e-4), (out2, ref2)

    # 4) bf16 logits: halves HBM bytes, math still f32 inside the kernel.
    xb = x0.astype(jnp.bfloat16)
    outb = jax.block_until_ready(cross_entropy_label_smooth(xb, t0, epsilon=0.1))
    refb = _reference(xb, t0, 0.1)   # reference upcasts the same bf16 values
    assert jnp.allclose(outb, refb, atol=1e-4, rtol=1e-3), (outb, refb)

    print("KERNEL_OK")
</pallas_src>

<mosaic_0001>
module attributes {stable_mosaic.version = 11 : i64} {
  func.func @_label_smooth_ce_kernel(%arg0: i32, %arg1: i32, %arg2: memref<8x16xf32, #tpu.memory_space<vmem>>, %arg3: memref<8x1xi32, #tpu.memory_space<vmem>>, %arg4: memref<8x1xf32, #tpu.memory_space<vmem>>, %arg5: memref<8x1xf32, #tpu.memory_space<vmem>>, %arg6: memref<8x1xf32, #tpu.memory_space<vmem>>, %arg7: memref<8x1xf32, #tpu.memory_space<vmem>>, %arg8: memref<8x1xf32, #tpu.memory_space<vmem>>) attributes {dimension_semantics = [#tpu.dimension_semantics<parallel>, #tpu.dimension_semantics<arbitrary>], iteration_bounds = array<i64: 1, 1>, scalar_prefetch = 0 : i64, scratch_operands = 4 : i64, tpu.core_type = #tpu.core_type<tc>, window_params = [{transform_indices = @transform_0, window_bounds = array<i64: 8, 16>}, {transform_indices = @transform_1, window_bounds = array<i64: 8, 1>}, {transform_indices = @transform_2, window_bounds = array<i64: 8, 1>}]} {
    %c0_i32 = arith.constant 0 : i32
    %0 = arith.cmpi eq, %arg1, %c0_i32 : i32
    %1 = arith.extui %0 : i1 to i32
    %c0_i32_0 = arith.constant 0 : i32
    %2 = arith.cmpi ne, %1, %c0_i32_0 : i32
    scf.if %2 {
      %cst_29 = arith.constant 0xFF800000 : f32
      %48 = vector.broadcast %cst_29 : f32 to vector<8x1xf32>
      %c0_30 = arith.constant 0 : index
      %c0_31 = arith.constant 0 : index
      %49 = vector.load %arg5[%c0_30, %c0_31] : memref<8x1xf32, #tpu.memory_space<vmem>>, vector<8x1xf32>
      tpu.vector_store %arg5[%c0_30, %c0_31], %48 {strides = array<i32>} : memref<8x1xf32, #tpu.memory_space<vmem>>, vector<8x1xf32>,
      %cst_32 = arith.constant 0.000000e+00 : f32
      %50 = vector.broadcast %cst_32 : f32 to vector<8x1xf32>
      %c0_33 = arith.constant 0 : index
      %c0_34 = arith.constant 0 : index
      %51 = vector.load %arg6[%c0_33, %c0_34] : memref<8x1xf32, #tpu.memory_space<vmem>>, vector<8x1xf32>
      tpu.vector_store %arg6[%c0_33, %c0_34], %50 {strides = array<i32>} : memref<8x1xf32, #tpu.memory_space<vmem>>, vector<8x1xf32>,
      %cst_35 = arith.constant 0.000000e+00 : f32
      %52 = vector.broadcast %cst_35 : f32 to vector<8x1xf32>
      %c0_36 = arith.constant 0 : index
      %c0_37 = arith.constant 0 : index
      %53 = vector.load %arg7[%c0_36, %c0_37] : memref<8x1xf32, #tpu.memory_space<vmem>>, vector<8x1xf32>
      tpu.vector_store %arg7[%c0_36, %c0_37], %52 {strides = array<i32>} : memref<8x1xf32, #tpu.memory_space<vmem>>, vector<8x1xf32>,
      %cst_38 = arith.constant 0.000000e+00 : f32
      %54 = vector.broadcast %cst_38 : f32 to vector<8x1xf32>
      %c0_39 = arith.constant 0 : index
      %c0_40 = arith.constant 0 : index
      %55 = vector.load %arg8[%c0_39, %c0_40] : memref<8x1xf32, #tpu.memory_space<vmem>>, vector<8x1xf32>
      tpu.vector_store %arg8[%c0_39, %c0_40], %54 {strides = array<i32>} : memref<8x1xf32, #tpu.memory_space<vmem>>, vector<8x1xf32>,
    } else {
    }
    %c0 = arith.constant 0 : index
    %c0_1 = arith.constant 0 : index
    %3 = vector.load %arg2[%c0, %c0_1] : memref<8x16xf32, #tpu.memory_space<vmem>>, vector<8x16xf32>
    %c16_i32 = arith.constant 16 : i32
    %4 = arith.muli %arg1, %c16_i32 : i32
    %5 = tpu.iota {dimensions = array<i32: 1>} : vector<8x16xi32>
    %6 = vector.broadcast %4 : i32 to vector<8x16xi32>
    %7 = arith.addi %6, %5 : vector<8x16xi32>
    %c16_i32_2 = arith.constant 16 : i32
    %8 = vector.broadcast %c16_i32_2 : i32 to vector<8x16xi32>
    %9 = arith.cmpi slt, %7, %8 : vector<8x16xi32>
    %cst = arith.constant 0xFF800000 : f32
    %10 = vector.broadcast %cst : f32 to vector<8x16xf32>
    %11 = arith.select %9, %3, %10 : vector<8x16xi1>, vector<8x16xf32>
    %cst_3 = arith.constant 0.000000e+00 : f32
    %12 = vector.broadcast %cst_3 : f32 to vector<8x16xf32>
    %13 = arith.select %9, %3, %12 : vector<8x16xi1>, vector<8x16xf32>
    %c0_4 = arith.constant 0 : index
    %c0_5 = arith.constant 0 : index
    %14 = vector.load %arg5[%c0_4, %c0_5] : memref<8x1xf32, #tpu.memory_space<vmem>>, vector<8x1xf32>
    %cst_6 = arith.constant dense<0xFF800000> : vector<8xf32>
    %15 = vector.multi_reduction <maximumf>, %11, %cst_6 [1] : vector<8x16xf32> to vector<8xf32>
    %16 = vector.shape_cast %15 : vector<8xf32> to vector<8x1xf32>
    %17 = arith.maximumf %14, %16 : vector<8x1xf32>
    %18 = arith.subf %14, %17 : vector<8x1xf32>
    %19 = math.exp %18 : vector<8x1xf32>
    %c0_7 = arith.constant 0 : index
    %c0_8 = arith.constant 0 : index
    %20 = vector.load %arg6[%c0_7, %c0_8] : memref<8x1xf32, #tpu.memory_space<vmem>>, vector<8x1xf32>
    %21 = arith.mulf %19, %20 : vector<8x1xf32>
    %22 = vector.broadcast %17 : vector<8x1xf32> to vector<8x16xf32>
    %23 = arith.subf %11, %22 : vector<8x16xf32>
    %24 = math.exp %23 : vector<8x16xf32>
    %cst_9 = arith.constant dense<0.000000e+00> : vector<8xf32>
    %25 = vector.multi_reduction <add>, %24, %cst_9 [1] : vector<8x16xf32> to vector<8xf32>
    %26 = vector.shape_cast %25 : vector<8xf32> to vector<8x1xf32>
    %27 = arith.addf %21, %26 : vector<8x1xf32>
    %c0_10 = arith.constant 0 : index
    %c0_11 = arith.constant 0 : index
    %28 = vector.load %arg6[%c0_10, %c0_11] : memref<8x1xf32, #tpu.memory_space<vmem>>, vector<8x1xf32>
    tpu.vector_store %arg6[%c0_10, %c0_11], %27 {strides = array<i32>} : memref<8x1xf32, #tpu.memory_space<vmem>>, vector<8x1xf32>,
    %c0_12 = arith.constant 0 : index
    %c0_13 = arith.constant 0 : index
    %29 = vector.load %arg5[%c0_12, %c0_13] : memref<8x1xf32, #tpu.memory_space<vmem>>, vector<8x1xf32>
    tpu.vector_store %arg5[%c0_12, %c0_13], %17 {strides = array<i32>} : memref<8x1xf32, #tpu.memory_space<vmem>>, vector<8x1xf32>,
    %c0_14 = arith.constant 0 : index
    %c0_15 = arith.constant 0 : index
    %30 = vector.load %arg7[%c0_14, %c0_15] : memref<8x1xf32, #tpu.memory_space<vmem>>, vector<8x1xf32>
    %cst_16 = arith.constant dense<0.000000e+00> : vector<8xf32>
    %31 = vector.multi_reduction <add>, %13, %cst_16 [1] : vector<8x16xf32> to vector<8xf32>
    %32 = vector.shape_cast %31 : vector<8xf32> to vector<8x1xf32>
    %33 = arith.addf %30, %32 : vector<8x1xf32>
    %c0_17 = arith.constant 0 : index
    %c0_18 = arith.constant 0 : index
    %34 = vector.load %arg7[%c0_17, %c0_18] : memref<8x1xf32, #tpu.memory_space<vmem>>, vector<8x1xf32>
    tpu.vector_store %arg7[%c0_17, %c0_18], %33 {strides = array<i32>} : memref<8x1xf32, #tpu.memory_space<vmem>>, vector<8x1xf32>,
    %c0_19 = arith.constant 0 : index
    %c0_20 = arith.constant 0 : index
    %35 = vector.load %arg8[%c0_19, %c0_20] : memref<8x1xf32, #tpu.memory_space<vmem>>, vector<8x1xf32>
    %c0_21 = arith.constant 0 : index
    %c0_22 = arith.constant 0 : index
    %36 = vector.load %arg3[%c0_21, %c0_22] : memref<8x1xi32, #tpu.memory_space<vmem>>, vector<8x1xi32>
    %37 = vector.broadcast %36 : vector<8x1xi32> to vector<8x16xi32>
    %38 = arith.cmpi eq, %7, %37 : vector<8x16xi32>
    %cst_23 = arith.constant 0.000000e+00 : f32
    %39 = vector.broadcast %cst_23 : f32 to vector<8x16xf32>
    %40 = arith.select %38, %3, %39 : vector<8x16xi1>, vector<8x16xf32>
    %cst_24 = arith.constant dense<0.000000e+00> : vector<8xf32>
    %41 = vector.multi_reduction <add>, %40, %cst_24 [1] : vector<8x16xf32> to vector<8xf32>
    %42 = vector.shape_cast %41 : vector<8xf32> to vector<8x1xf32>
    %43 = arith.addf %35, %42 : vector<8x1xf32>
    %c0_25 = arith.constant 0 : index
    %c0_26 = arith.constant 0 : index
    %44 = vector.load %arg8[%c0_25, %c0_26] : memref<8x1xf32, #tpu.memory_space<vmem>>, vector<8x1xf32>
    tpu.vector_store %arg8[%c0_25, %c0_26], %43 {strides = array<i32>} : memref<8x1xf32, #tpu.memory_space<vmem>>, vector<8x1xf32>,
    %c0_i32_27 = arith.constant 0 : i32
    %45 = arith.cmpi eq, %arg1, %c0_i32_27 : i32
    %46 = arith.extui %45 : i1 to i32
    %c0_i32_28 = arith.constant 0 : i32
    %47 = arith.cmpi ne, %46, %c0_i32_28 : i32
    scf.if %47 {
      %c0_29 = arith.constant 0 : index
      %c0_30 = arith.constant 0 : index
      %48 = vector.load %arg5[%c0_29, %c0_30] : memref<8x1xf32, #tpu.memory_space<vmem>>, vector<8x1xf32>
      %c0_31 = arith.constant 0 : index
      %c0_32 = arith.constant 0 : index
      %49 = vector.load %arg6[%c0_31, %c0_32] : memref<8x1xf32, #tpu.memory_space<vmem>>, vector<8x1xf32>
      %50 = math.log %49 : vector<8x1xf32>
      %51 = arith.addf %48, %50 : vector<8x1xf32>
      %c0_33 = arith.constant 0 : index
      %c0_34 = arith.constant 0 : index
      %52 = vector.load %arg8[%c0_33, %c0_34] : memref<8x1xf32, #tpu.memory_space<vmem>>, vector<8x1xf32>
      %cst_35 = arith.constant 0.899999976 : f32
      %53 = vector.broadcast %cst_35 : f32 to vector<8x1xf32>
      %54 = arith.mulf %53, %52 : vector<8x1xf32>
      %55 = arith.subf %51, %54 : vector<8x1xf32>
      %c0_36 = arith.constant 0 : index
      %c0_37 = arith.constant 0 : index
      %56 = vector.load %arg7[%c0_36, %c0_37] : memref<8x1xf32, #tpu.memory_space<vmem>>, vector<8x1xf32>
      %cst_38 = arith.constant 6.250000e-03 : f32
      %57 = vector.broadcast %cst_38 : f32 to vector<8x1xf32>
      %58 = arith.mulf %57, %56 : vector<8x1xf32>
      %59 = arith.subf %55, %58 : vector<8x1xf32>
      %c0_39 = arith.constant 0 : index
      %c0_40 = arith.constant 0 : index
      %60 = vector.load %arg4[%c0_39, %c0_40] : memref<8x1xf32, #tpu.memory_space<vmem>>, vector<8x1xf32>
      tpu.vector_store %arg4[%c0_39, %c0_40], %59 {strides = array<i32>} : memref<8x1xf32, #tpu.memory_space<vmem>>, vector<8x1xf32>,
    } else {
    }
    return
  }
  func.func @transform_0(%arg0: i32, %arg1: i32) -> (i32, i32) {
    %c0_i32 = arith.constant 0 : i32
    return %arg0, %arg1 : i32, i32
  }
  func.func @transform_1(%arg0: i32, %arg1: i32) -> (i32, i32) {
    %c0_i32 = arith.constant 0 : i32
    %c0_i32_0 = arith.constant 0 : i32
    return %arg0, %c0_i32 : i32, i32
  }
  func.func @transform_2(%arg0: i32, %arg1: i32) -> (i32, i32) {
    %c0_i32 = arith.constant 0 : i32
    %c0_i32_0 = arith.constant 0 : i32
    return %arg0, %c0_i32 : i32, i32
  }
}

</mosaic_0001>

<bundles_post_ra>
// kernel: tpu_custom_call.1
= control target key start
LH: loop header
LB: loop body
LE: loop exit
PB: predicated region body
PF: predicated region fallthrough
CT: control target
= control target key end

     0   :  { %v22_v0 = vlaneseq  ;;  %vm15_vm0 = vcmask 7168   ;;  %v103_v1 = vmov -inf   ;;  %vm30_vm1 = vcmask 130048   ;;  %s145_s0 = inlined_call_operand.vmem [shape: f32[8,16], index: 0, kind: input, shape index: {}]   ;;  %s146_s1 = inlined_call_operand.vmem [shape: s32[8,1], index: 1, kind: input, shape index: {}]   ;;  %s147_s2 = inlined_call_operand.vmem [shape: f32[8,1], index: 2, kind: output, shape index: {}]  }
   0x1   :  { %16 = vst.msk [vmem:[#allocation2] sm:$0xff] %vm15_vm0, %v103_v1  ;;  %v20_v2 = vld [vmem:[%s145_s0] sm:$0xff]  ;;  %v104_v6 = vmov 0   ;;  %v105_v7 = vmov 0.0  }
   0x2   :  { %v23_v3 = vand.u32 127, %v22_v0  ;;  %95 = vset.pattern.permute.xlu0 %v104_v6  ;;  %96 = vset.pattern.permute.xlu1 %v104_v6  ;;  %17 = vst.msk [vmem:[#allocation3] sm:$0xff] %vm15_vm0, %v105_v7  ;;  %v62_v8 = vld [vmem:[%s146_s1] sm:$0xff] }
   0x3   :  { %18 = vst.msk [vmem:[#allocation4] sm:$0xff] %vm15_vm0, %v105_v7  ;;  %64 = vperm.xlu1 %96, %v62_v8  }
   0x4   :  { %vm26_vm2 = vcmp.lt.s32.totalorder %v23_v3, 16  ;;  %19 = vst.msk [vmem:[#allocation5] sm:$0xff] %vm15_vm0, %v105_v7 }
   0x5   :  { %v27_v4 = vsel %vm26_vm2, %v20_v2, -inf  ;;  %v28_v16 = vsel %vm26_vm2, %v20_v2, 0.0 }
   0x6   :  { %v31_v5 = vsel %vm30_vm1, %v27_v4, -inf  ;;  %v56_v17 = vsel %vm30_vm1, %v28_v16, 0.0 }
   0x7   :  { %32 = vmax.xlane.f32.xlu0 %v31_v5 }
   0x8   :  { %v29_v9 = vld [vmem:[#allocation2] sm:$0xff] }
   0x9   :  { %v38_v31 = vld [vmem:[#allocation3] sm:$0xff] }
   0xa   :  { %v55_v26 = vld [vmem:[#allocation4] sm:$0xff] }
   0xb   :  { %v61_v23 = vld [vmem:[#allocation5] sm:$0xff] }
  0x75   :  { %v65_v13 = vpop.permute.xlu1 %64 }
  0x76   :  { %vm66_vm3 = vcmp.eq.s32.totalorder %v23_v3, %v65_v13 }
  0x77   :  { %v67_v14 = vsel %vm66_vm3, %v20_v2, 0.0 }
  0x78   :  { %v68_v15 = vsel %vm30_vm1, %v67_v14, 0.0 }
  0x79   :  { %69 = vadd.xlane.f32.xlu2 %v68_v15 }
  0x7a   :  { %v33_v10 = vpop.xlane.xlu0 %32 }
  0x7b   :  { %v34_v11 = vmax.f32 %v29_v9, %v33_v10 }
  0x7d   :  { %v35_v12 = vsub.f32 %v29_v9, %v34_v11  ;;  %54 = vst.msk [vmem:[#allocation2] sm:$0xff] %vm15_vm0, %v34_v11  ;;  %42 = vperm.xlu0 %95, %v34_v11  }
  0x7f   :  { %v36_v29 = vmul.f32 1.442695, %v35_v12 }
  0x81   :  { %57 = vadd.xlane.f32.xlu2 %v56_v17 }
  0x84   :  { %v76_v40 = vld [vmem:[#allocation2] sm:$0xff] }
  0xec   :  { %v70_v24 = vpop.xlane.xlu2 %69 }
  0xed   :  { %v71_v25 = vadd.f32 %v70_v24, %v61_v23 }
  0xef   :  { %v43_v18 = vpop.permute.xlu0 %42  ;;  %72 = vst.msk [vmem:[#allocation5] sm:$0xff] %vm15_vm0, %v71_v25 }
  0xf0   :  { %v45_v19 = vsub.f32 %v27_v4, %v43_v18 }
  0xf2   :  { %v46_v20 = vmul.f32 1.442695, %v45_v19 }
  0xf4   :  { %97 = vpow2.f32 %v46_v20  ;;  %v58_v27 = vpop.xlane.xlu2 %57 }
  0xf5   :  { %v59_v28 = vadd.f32 %v58_v27, %v55_v26  ;;  %99 = vpow2.f32 %v36_v29 }
  0xf6   :  { %v81_v37 = vld [vmem:[#allocation5] sm:$0xff] }
  0xf7   :  { %60 = vst.msk [vmem:[#allocation4] sm:$0xff] %vm15_vm0, %v59_v28  ;;  %v82_v42 = vmul.f32 0.9, %v81_v37 }
  0xfa   :  { %v98_v21 = vpop.eup %97 }
  0xfb   :  { %v48_v22 = vsel %vm30_vm1, %v98_v21, 0.0  ;;  %v100_v30 = vpop.eup %99 }
  0xfc   :  { %49 = vadd.xlane.f32.xlu1 %v48_v22  ;;  %v39_v32 = vmul.f32 %v100_v30, %v38_v31 }
  0xfe   :  { %v84_v38 = vld [vmem:[#allocation4] sm:$0xff] }
  0xff   :  { %v85_v43 = vmul.f32 0.00625, %v84_v38 }
 0x16f   :  { %v50_v33 = vpop.xlane.xlu1 %49 }
 0x170   :  { %v51_v34 = vadd.f32 %v50_v33, %v39_v32 }
 0x172   :  { %53 = vst.msk [vmem:[#allocation3] sm:$0xff] %vm15_vm0, %v51_v34 }
 0x179   :  { %v77_v35 = vld [vmem:[#allocation3] sm:$0xff] }
 0x17a   :  { %101 = vlog2.f32 %v77_v35 }
 0x180   :  { %v102_v36 = vpop.eup %101 }
 0x181   :  { %v79_v39 = vmul.f32 0.6931472, %v102_v36 }
 0x183   :  { %v80_v41 = vadd.f32 %v79_v39, %v76_v40 }
 0x185   :  { %v83_v44 = vsub.f32 %v80_v41, %v82_v42 }
 0x187   :  { %v86_v45 = vsub.f32 %v83_v44, %v85_v43 }
 0x189   :  { %87 = vst.msk [vmem:[%s147_s2] sm:$0xff] %vm15_vm0, %v86_v45 }

</bundles_post_ra>
